<compile_context>
chip_gen: v7x
topology: tpu7x:2x2x1
jax: 0.10.0
libtpu: 0.0.40
codegen_flags: <defaults>
</compile_context>

<pallas_src>
import functools

import numpy as np
import jax
import jax.numpy as jnp
from jax.experimental import pallas as pl
from jax.experimental.pallas import tpu as pltpu


# ----------------------------------------------------------------------------
# Small helpers
# ----------------------------------------------------------------------------

def _cp(*sem):
    return pltpu.CompilerParams(dimension_semantics=tuple(sem),
                                vmem_limit_bytes=32 * 1024 * 1024)


def _round_up(x, m):
    return ((x + m - 1) // m) * m


def _row_tiling(M, tmax=512):
    """Pick a row tile (multiple of 8, up to tmax) and the padded row count."""
    tm = min(tmax, _round_up(M, 8))
    Mp = _round_up(M, tm)
    return tm, Mp


def _pad_rows(x, Mp):
    M = x.shape[0]
    return x if Mp == M else jnp.pad(x, ((0, Mp - M), (0, 0)))


def _channel_tile(C):
    if C <= 512:
        return C
    for t in (512, 256, 128):
        if C % t == 0:
            return t
    return C


def _sigmoid(x):
    # exp-based sigmoid (EUP exp) — avoids relying on logistic lowering.
    return 1.0 / (1.0 + jnp.exp(-x))


def _gelu_tanh(x):
    # tanh-approx GELU, tanh expressed via exp.
    inner = 0.7978845608028654 * (x + 0.044715 * x * x * x)
    t = 2.0 * _sigmoid(2.0 * inner) - 1.0
    return 0.5 * x * (1.0 + t)


def _layernorm_f32(x, g, b, eps):
    mu = jnp.mean(x, axis=-1, keepdims=True)
    xc = x - mu
    var = jnp.mean(xc * xc, axis=-1, keepdims=True)
    return xc * jax.lax.rsqrt(var + eps) * g + b


def _dot_bf16(a, b):
    return jnp.dot(a.astype(jnp.bfloat16), b.astype(jnp.bfloat16),
                   preferred_element_type=jnp.float32)


# ----------------------------------------------------------------------------
# Pallas kernels
# ----------------------------------------------------------------------------

def _linear_kernel(x_ref, w_ref, b_ref, o_ref):
    acc = _dot_bf16(x_ref[...], w_ref[...]) + b_ref[...].astype(jnp.float32)
    o_ref[...] = acc.astype(o_ref.dtype)


def _linear_res_kernel(x_ref, r_ref, w_ref, b_ref, o_ref):
    acc = _dot_bf16(x_ref[...], w_ref[...]) + b_ref[...].astype(jnp.float32)
    o_ref[...] = (r_ref[...].astype(jnp.float32) + acc).astype(o_ref.dtype)


def _ff_kernel(x_ref, g_ref, b_ref, w1_ref, b1_ref, w2_ref, b2_ref,
               pg_ref, pb_ref, o_ref, *, eps, scale, post_ln):
    """y = x + scale * (SiLU(LN(x) @ w1 + b1) @ w2 + b2); optional post-LayerNorm."""
    x = x_ref[...].astype(jnp.float32)
    xn = _layernorm_f32(x, g_ref[...].astype(jnp.float32),
                        b_ref[...].astype(jnp.float32), eps)
    h = _dot_bf16(xn, w1_ref[...]) + b1_ref[...].astype(jnp.float32)
    h = h * _sigmoid(h)                                     # SiLU / Swish
    h = _dot_bf16(h, w2_ref[...]) + b2_ref[...].astype(jnp.float32)
    y = x + scale * h
    if post_ln:
        y = _layernorm_f32(y, pg_ref[...].astype(jnp.float32),
                           pb_ref[...].astype(jnp.float32), eps)
    o_ref[...] = y.astype(o_ref.dtype)


def _ln_matmul_kernel(x_ref, g_ref, b_ref, w_ref, bias_ref, o_ref, *, eps):
    """o = LN(x) @ w + bias   (used for the fused QKV projection)."""
    x = x_ref[...].astype(jnp.float32)
    xn = _layernorm_f32(x, g_ref[...].astype(jnp.float32),
                        b_ref[...].astype(jnp.float32), eps)
    o_ref[...] = (_dot_bf16(xn, w_ref[...]) +
                  bias_ref[...].astype(jnp.float32)).astype(o_ref.dtype)


def _ln_glu_kernel(x_ref, g_ref, b_ref, wa_ref, ba_ref, wb_ref, bb_ref, o_ref, *, eps):
    """o = (LN(x) @ wa + ba) * sigmoid(LN(x) @ wb + bb)   (LN -> pointwise-1 -> GLU)."""
    x = x_ref[...].astype(jnp.float32)
    xn = _layernorm_f32(x, g_ref[...].astype(jnp.float32),
                        b_ref[...].astype(jnp.float32), eps)
    a = _dot_bf16(xn, wa_ref[...]) + ba_ref[...].astype(jnp.float32)
    gate = _dot_bf16(xn, wb_ref[...]) + bb_ref[...].astype(jnp.float32)
    o_ref[...] = (a * _sigmoid(gate)).astype(o_ref.dtype)


def _attn_kernel(q_ref, k_ref, v_ref, o_ref, *, scale):
    """Per-(batch*head) softmax(q k^T * scale) v on a query tile."""
    q = q_ref[0].astype(jnp.float32) * scale                # (tq, Dh)
    k = k_ref[0].astype(jnp.float32)                        # (N,  Dh)
    v = v_ref[0].astype(jnp.float32)
    s = _dot_bf16(q, k.T)                                   # (tq, N)
    m = jnp.max(s, axis=-1, keepdims=True)
    p = jnp.exp(s - m)
    l = jnp.sum(p, axis=-1, keepdims=True)
    o = _dot_bf16(p, v)
    o_ref[0] = (o * pl.reciprocal(l, approx=True)).astype(o_ref.dtype)


def _dwconv_kernel(x_ref, w_ref, b_ref, o_ref, *, K, pad_l):
    """Token-major depthwise conv over the sequence axis, BN pre-folded, Swish fused."""
    x = x_ref[0].astype(jnp.float32)                        # (N, Ct)
    N, C = x.shape
    pad_r = K - 1 - pad_l
    pieces = []
    if pad_l > 0:
        pieces.append(jnp.zeros((pad_l, C), jnp.float32))
    pieces.append(x)
    if pad_r > 0:
        pieces.append(jnp.zeros((pad_r, C), jnp.float32))
    xp = jnp.concatenate(pieces, axis=0) if len(pieces) > 1 else x   # (N+K-1, C)
    w = w_ref[...].astype(jnp.float32)                      # (K, Ct) read once
    acc = jnp.zeros((N, C), jnp.float32)
    for k in range(K):
        acc = acc + w[k:k + 1, :] * xp[k:k + N, :]
    acc = acc + b_ref[...].astype(jnp.float32)
    o_ref[0] = (acc * _sigmoid(acc)).astype(o_ref.dtype)    # Swish


def _upconv_kernel(x_ref, w_ref, g_ref, b_ref, o_ref, *, groups, eps):
    """Nearest x2 upsample + Conv1d(k=3, pad=1, no bias) + optional GroupNorm + GELU.

    Token-major: x (L, Cin) in, (L, 2*Cout) out where columns [:Cout] are the even
    output positions and [Cout:] the odd ones (interleaved by a free reshape outside)."""
    x = x_ref[0].astype(jnp.float32)                        # (L, Cin)
    L, Cin = x.shape
    Cout2 = o_ref.shape[2]
    zero = jnp.zeros((1, Cin), jnp.float32)
    x_prev = jnp.concatenate([zero, x[:L - 1, :]], axis=0)
    x_next = jnp.concatenate([x[1:, :], zero], axis=0)
    xs = jnp.concatenate([x_prev, x, x_next], axis=1)       # (L, 3*Cin)
    y = _dot_bf16(xs, w_ref[...])                           # (L, 2*Cout)

    if groups > 0:
        Cout = Cout2 // 2
        cg = Cout // groups
        lane_c = jax.lax.broadcasted_iota(jnp.int32, (Cout2, groups), 0)
        gid_c = jax.lax.broadcasted_iota(jnp.int32, (Cout2, groups), 1)
        G = ((lane_c % Cout) // cg == gid_c).astype(jnp.float32)      # (2C, groups)
        gid_r = jax.lax.broadcasted_iota(jnp.int32, (groups, Cout2), 0)
        lane_r = jax.lax.broadcasted_iota(jnp.int32, (groups, Cout2), 1)
        GT = ((lane_r % Cout) // cg == gid_r).astype(jnp.float32)     # (groups, 2C)
        cnt = jnp.float32(cg * 2 * L)
        col_sum = jnp.sum(y, axis=0, keepdims=True)                   # (1, 2C)
        mean_g = jnp.dot(col_sum, G, preferred_element_type=jnp.float32) / cnt
        mean_c = jnp.dot(mean_g, GT, preferred_element_type=jnp.float32)
        yc = y - mean_c
        ss = jnp.sum(yc * yc, axis=0, keepdims=True)
        var_g = jnp.dot(ss, G, preferred_element_type=jnp.float32) / cnt
        inv_c = jnp.dot(jax.lax.rsqrt(var_g + eps), GT,
                        preferred_element_type=jnp.float32)
        y = yc * inv_c * g_ref[...].astype(jnp.float32) + b_ref[...].astype(jnp.float32)

    o_ref[0] = _gelu_tanh(y).astype(o_ref.dtype)


# ----------------------------------------------------------------------------
# Kernel wrappers
# ----------------------------------------------------------------------------

def pallas_linear(x, w, b):
    M, K = x.shape
    N = w.shape[1]
    tm, Mp = _row_tiling(M)
    xp = _pad_rows(x, Mp)
    out = pl.pallas_call(
        _linear_kernel,
        grid=(Mp // tm,),
        out_shape=jax.ShapeDtypeStruct((Mp, N), jnp.float32),
        in_specs=[pl.BlockSpec((tm, K), lambda i: (i, 0)),
                  pl.BlockSpec((K, N), lambda i: (0, 0)),
                  pl.BlockSpec((1, N), lambda i: (0, 0))],
        out_specs=pl.BlockSpec((tm, N), lambda i: (i, 0)),
        compiler_params=_cp("parallel"),
    )(xp, w, b.reshape(1, N))
    return out[:M]


def pallas_linear_residual(x, res, w, b):
    M, K = x.shape
    N = w.shape[1]
    tm, Mp = _row_tiling(M)
    xp, rp = _pad_rows(x, Mp), _pad_rows(res, Mp)
    out = pl.pallas_call(
        _linear_res_kernel,
        grid=(Mp // tm,),
        out_shape=jax.ShapeDtypeStruct((Mp, N), jnp.float32),
        in_specs=[pl.BlockSpec((tm, K), lambda i: (i, 0)),
                  pl.BlockSpec((tm, N), lambda i: (i, 0)),
                  pl.BlockSpec((K, N), lambda i: (0, 0)),
                  pl.BlockSpec((1, N), lambda i: (0, 0))],
        out_specs=pl.BlockSpec((tm, N), lambda i: (i, 0)),
        compiler_params=_cp("parallel"),
    )(xp, rp, w, b.reshape(1, N))
    return out[:M]


def pallas_ff(x, f, scale, post_g=None, post_b=None, eps=1e-5):
    M, D = x.shape
    F = f['w1'].shape[1]
    tm, Mp = _row_tiling(M)
    xp = _pad_rows(x, Mp)
    post_ln = post_g is not None
    if post_g is None:
        post_g = jnp.ones((D,), jnp.float32)
        post_b = jnp.zeros((D,), jnp.float32)
    out = pl.pallas_call(
        functools.partial(_ff_kernel, eps=eps, scale=scale, post_ln=post_ln),
        grid=(Mp // tm,),
        out_shape=jax.ShapeDtypeStruct((Mp, D), jnp.float32),
        in_specs=[pl.BlockSpec((tm, D), lambda i: (i, 0)),
                  pl.BlockSpec((1, D), lambda i: (0, 0)),
                  pl.BlockSpec((1, D), lambda i: (0, 0)),
                  pl.BlockSpec((D, F), lambda i: (0, 0)),
                  pl.BlockSpec((1, F), lambda i: (0, 0)),
                  pl.BlockSpec((F, D), lambda i: (0, 0)),
                  pl.BlockSpec((1, D), lambda i: (0, 0)),
                  pl.BlockSpec((1, D), lambda i: (0, 0)),
                  pl.BlockSpec((1, D), lambda i: (0, 0))],
        out_specs=pl.BlockSpec((tm, D), lambda i: (i, 0)),
        compiler_params=_cp("parallel"),
    )(xp, f['ln_g'].reshape(1, D), f['ln_b'].reshape(1, D),
      f['w1'], f['b1'].reshape(1, F), f['w2'], f['b2'].reshape(1, D),
      post_g.reshape(1, D), post_b.reshape(1, D))
    return out[:M]


def pallas_ln_matmul(x, g, b, w, bias, eps=1e-5):
    M, D = x.shape
    N = w.shape[1]
    tm, Mp = _row_tiling(M)
    xp = _pad_rows(x, Mp)
    out = pl.pallas_call(
        functools.partial(_ln_matmul_kernel, eps=eps),
        grid=(Mp // tm,),
        out_shape=jax.ShapeDtypeStruct((Mp, N), jnp.float32),
        in_specs=[pl.BlockSpec((tm, D), lambda i: (i, 0)),
                  pl.BlockSpec((1, D), lambda i: (0, 0)),
                  pl.BlockSpec((1, D), lambda i: (0, 0)),
                  pl.BlockSpec((D, N), lambda i: (0, 0)),
                  pl.BlockSpec((1, N), lambda i: (0, 0))],
        out_specs=pl.BlockSpec((tm, N), lambda i: (i, 0)),
        compiler_params=_cp("parallel"),
    )(xp, g.reshape(1, D), b.reshape(1, D), w, bias.reshape(1, N))
    return out[:M]


def pallas_ln_glu(x, g, b, wa, ba, wb, bb, eps=1e-5):
    M, D = x.shape
    inner = wa.shape[1]
    tm, Mp = _row_tiling(M)
    xp = _pad_rows(x, Mp)
    out = pl.pallas_call(
        functools.partial(_ln_glu_kernel, eps=eps),
        grid=(Mp // tm,),
        out_shape=jax.ShapeDtypeStruct((Mp, inner), jnp.float32),
        in_specs=[pl.BlockSpec((tm, D), lambda i: (i, 0)),
                  pl.BlockSpec((1, D), lambda i: (0, 0)),
                  pl.BlockSpec((1, D), lambda i: (0, 0)),
                  pl.BlockSpec((D, inner), lambda i: (0, 0)),
                  pl.BlockSpec((1, inner), lambda i: (0, 0)),
                  pl.BlockSpec((D, inner), lambda i: (0, 0)),
                  pl.BlockSpec((1, inner), lambda i: (0, 0))],
        out_specs=pl.BlockSpec((tm, inner), lambda i: (i, 0)),
        compiler_params=_cp("parallel"),
    )(xp, g.reshape(1, D), b.reshape(1, D),
      wa, ba.reshape(1, inner), wb, bb.reshape(1, inner))
    return out[:M]


def pallas_attention(q, k, v):
    """q, k, v: (B*H, N, Dh).  Query-tiled; keys/values loaded per head."""
    BH, N, Dh = q.shape
    scale = float(Dh) ** -0.5
    tq, Np = _row_tiling(N, tmax=256)
    qp = q if Np == N else jnp.pad(q, ((0, 0), (0, Np - N), (0, 0)))
    out = pl.pallas_call(
        functools.partial(_attn_kernel, scale=scale),
        grid=(BH, Np // tq),
        out_shape=jax.ShapeDtypeStruct((BH, Np, Dh), jnp.float32),
        in_specs=[pl.BlockSpec((1, tq, Dh), lambda h, i: (h, i, 0)),
                  pl.BlockSpec((1, N, Dh), lambda h, i: (h, 0, 0)),
                  pl.BlockSpec((1, N, Dh), lambda h, i: (h, 0, 0))],
        out_specs=pl.BlockSpec((1, tq, Dh), lambda h, i: (h, i, 0)),
        compiler_params=_cp("parallel", "parallel"),
    )(qp, k, v)
    return out[:, :N]


def pallas_depthwise_conv(x, w, b):
    """x: (B, N, C) token-major; w: (K, C) BN-folded; b: (1, C).  Swish fused."""
    B, N, C = x.shape
    K = w.shape[0]
    tc = _channel_tile(C)
    return pl.pallas_call(
        functools.partial(_dwconv_kernel, K=K, pad_l=K // 2),
        grid=(B, C // tc),
        out_shape=jax.ShapeDtypeStruct((B, N, C), jnp.float32),
        in_specs=[pl.BlockSpec((1, N, tc), lambda bi, ci: (bi, 0, ci)),
                  pl.BlockSpec((K, tc), lambda bi, ci: (0, ci)),
                  pl.BlockSpec((1, tc), lambda bi, ci: (0, ci))],
        out_specs=pl.BlockSpec((1, N, tc), lambda bi, ci: (bi, 0, ci)),
        compiler_params=_cp("parallel", "parallel"),
    )(x, w, b)


def pallas_up2_conv3(x, w_stack, gn_g2=None, gn_b2=None, groups=0, eps=1e-5):
    """x: (B, L, Cin) -> (B, 2L, Cout).  Upsample x2 + conv k=3 + (GroupNorm) + GELU fused."""
    B, L, Cin = x.shape
    Cout2 = w_stack.shape[1]
    Cout = Cout2 // 2
    if gn_g2 is None:
        gn_g2 = jnp.ones((1, Cout2), jnp.float32)
        gn_b2 = jnp.zeros((1, Cout2), jnp.float32)
    out = pl.pallas_call(
        functools.partial(_upconv_kernel, groups=groups, eps=eps),
        grid=(B,),
        out_shape=jax.ShapeDtypeStruct((B, L, Cout2), jnp.float32),
        in_specs=[pl.BlockSpec((1, L, Cin), lambda bi: (bi, 0, 0)),
                  pl.BlockSpec((3 * Cin, Cout2), lambda bi: (0, 0)),
                  pl.BlockSpec((1, Cout2), lambda bi: (0, 0)),
                  pl.BlockSpec((1, Cout2), lambda bi: (0, 0))],
        out_specs=pl.BlockSpec((1, L, Cout2), lambda bi: (bi, 0, 0)),
        compiler_params=_cp("parallel"),
    )(x, w_stack, gn_g2, gn_b2)
    # (B, L, 2, Cout) -> (B, 2L, Cout): free row-major reshape interleaves even/odd positions.
    return out.reshape(B, 2 * L, Cout)


# ----------------------------------------------------------------------------
# Model forward
# ----------------------------------------------------------------------------

def conformer_block(x, p):
    B, N, D = x.shape
    H, Dh = p['heads'], p['dim_head']
    HDh = H * Dh
    M = B * N
    xf = x.reshape(M, D)

    # 0.5 * FeedForward #1 (fully fused, residual inside kernel)
    xf = pallas_ff(xf, p['ff1'], scale=0.5)

    # Multi-head self-attention: fused LN + QKV, per-head attention, fused out-proj + residual
    a = p['attn']
    qkv = pallas_ln_matmul(xf, a['ln_g'], a['ln_b'], a['w_qkv'], a['b_qkv'])
    q, k, v = qkv[:, :HDh], qkv[:, HDh:2 * HDh], qkv[:, 2 * HDh:]

    def heads(t):
        return t.reshape(B, N, H, Dh).transpose(0, 2, 1, 3).reshape(B * H, N, Dh)

    o = pallas_attention(heads(q), heads(k), heads(v))
    o = o.reshape(B, H, N, Dh).transpose(0, 2, 1, 3).reshape(M, HDh)
    xf = pallas_linear_residual(o, xf, a['wo'], a['bo'])

    # Convolution module, kept token-major (no HBM transposes):
    #   LN -> pointwise1 -> GLU  |  depthwise conv (BN folded) + Swish  |  pointwise2 + residual
    c = p['conv']
    h = pallas_ln_glu(xf, c['ln_g'], c['ln_b'], c['w_a'], c['b_a'], c['w_b'], c['b_b'])
    h = pallas_depthwise_conv(h.reshape(B, N, -1), c['w_dw'], c['b_dw'])
    xf = pallas_linear_residual(h.reshape(M, -1), xf, c['w_pw2'], c['b_pw2'])

    # 0.5 * FeedForward #2 fused with the post-LayerNorm
    xf = pallas_ff(xf, p['ff2'], scale=0.5,
                   post_g=p['post_ln_g'], post_b=p['post_ln_b'])
    return xf.reshape(B, N, D)


def decoder_forward(params, x, need_transpose=True):
    """Mirrors Decoder.forward for mask=None.  x: (B, N, input_dim)."""
    B, N, Din = x.shape
    dim = params['dim']

    # body_hand_fuse: Conv1d(input_dim, dim, 1) == per-token linear
    h = pallas_linear(x.reshape(B * N, Din), params['fuse_w'], params['fuse_b'])
    h = h.reshape(B, N, dim)

    for bp in params['blocks']:
        h = conformer_block(h, bp)

    # Upsample stack, token-major (B, length, channels) throughout — the torch b n d -> b d n
    # transposes are absorbed into the kernel layouts (equivalent math, no HBM transposes).
    out = h if need_transpose else h.transpose(0, 2, 1)

    for st in params['up_stages'][:-1]:
        out = pallas_up2_conv3(out, st['w_stack'], st['gn_g2'], st['gn_b2'],
                               groups=dim // 8)
    st = params['up_stages'][-1]
    out = pallas_up2_conv3(out, st['w_stack'], groups=0)      # final stage: no GroupNorm
    return out                                                # (B, up_N, output_dim)


# ----------------------------------------------------------------------------
# Parameter construction (deterministic) + BN / conv weight folding
# ----------------------------------------------------------------------------

def fold_bn_into_dwconv(w, b, rm, rv, g, beta, eps=1e-5):
    """Fold eval-mode BatchNorm1d into depthwise conv weight (K, C) and bias (C,)."""
    s = g / jnp.sqrt(rv + eps)
    return w * s[None, :], ((b - rm) * s + beta).reshape(1, -1)


def build_upconv_weight(w_taps):
    """(3, Cout, Cin) conv taps -> stacked (3*Cin, 2*Cout) weight for the fused
    upsample-x2 + k=3 conv (columns [:Cout] = even outputs, [Cout:] = odd outputs)."""
    W0, W1, W2 = w_taps[0].T, w_taps[1].T, w_taps[2].T        # each (Cin, Cout)
    Cin, Cout = W0.shape
    zero = jnp.zeros((Cin, Cout), jnp.float32)
    top = jnp.concatenate([W0, zero], axis=1)                 # multiplies x[j-1]
    mid = jnp.concatenate([W1 + W2, W0 + W1], axis=1)         # multiplies x[j]
    bot = jnp.concatenate([zero, W2], axis=1)                 # multiplies x[j+1]
    return jnp.concatenate([top, mid, bot], axis=0)           # (3*Cin, 2*Cout)


def init_params(key, *, input_dim, dim, output_dim, depth, heads, dim_head,
                ff_mult, conv_expansion, conv_kernel, up_sampling_ratio):
    keys = iter(jax.random.split(key, 4096))
    nk = lambda: next(keys)
    dense = lambda fi, fo: jax.random.normal(nk(), (fi, fo), jnp.float32) * 0.05

    inner_attn = heads * dim_head
    inner_conv = dim * conv_expansion

    params = dict(dim=dim)
    params['fuse_w'] = dense(input_dim, dim)
    params['fuse_b'] = jax.random.normal(nk(), (dim,), jnp.float32) * 0.01

    blocks = []
    for _ in range(depth):
        def ff():
            return dict(ln_g=jnp.ones((dim,)), ln_b=jnp.zeros((dim,)),
                        w1=dense(dim, dim * ff_mult), b1=jnp.zeros((dim * ff_mult,)),
                        w2=dense(dim * ff_mult, dim), b2=jnp.zeros((dim,)))

        w_dw = jax.random.normal(nk(), (conv_kernel, inner_conv), jnp.float32) * 0.05
        b_dw = jnp.zeros((inner_conv,))
        bn_rm, bn_rv = jnp.zeros((inner_conv,)), jnp.ones((inner_conv,))
        bn_g, bn_b = jnp.ones((inner_conv,)), jnp.zeros((inner_conv,))
        w_dw_f, b_dw_f = fold_bn_into_dwconv(w_dw, b_dw, bn_rm, bn_rv, bn_g, bn_b)

        bp = dict(
            heads=heads, dim_head=dim_head,
            ff1=ff(), ff2=ff(),
            attn=dict(ln_g=jnp.ones((dim,)), ln_b=jnp.zeros((dim,)),
                      w_qkv=dense(dim, 3 * inner_attn),            # fused Q|K|V
                      b_qkv=jnp.zeros((3 * inner_attn,)),
                      wo=dense(inner_attn, dim), bo=jnp.zeros((dim,))),
            conv=dict(ln_g=jnp.ones((dim,)), ln_b=jnp.zeros((dim,)),
                      w_a=dense(dim, inner_conv), b_a=jnp.zeros((inner_conv,)),
                      w_b=dense(dim, inner_conv), b_b=jnp.zeros((inner_conv,)),
                      w_dw=w_dw_f, b_dw=b_dw_f,
                      w_pw2=dense(inner_conv, dim), b_pw2=jnp.zeros((dim,))),
            post_ln_g=jnp.ones((dim,)), post_ln_b=jnp.zeros((dim,)),
        )
        blocks.append(bp)
    params['blocks'] = blocks

    n_intermediate = int(np.log2(up_sampling_ratio)) - 1
    stages = []
    for _ in range(n_intermediate):
        taps = jax.random.normal(nk(), (3, dim, dim), jnp.float32) * 0.05
        g, b = jnp.ones((dim,)), jnp.zeros((dim,))
        stages.append(dict(w_stack=build_upconv_weight(taps),
                           gn_g2=jnp.concatenate([g, g]).reshape(1, 2 * dim),
                           gn_b2=jnp.concatenate([b, b]).reshape(1, 2 * dim)))
    taps = jax.random.normal(nk(), (3, output_dim, dim), jnp.float32) * 0.05
    stages.append(dict(w_stack=build_upconv_weight(taps)))
    params['up_stages'] = stages
    return params


# ----------------------------------------------------------------------------
# Main
# ----------------------------------------------------------------------------

if __name__ == "__main__":
    key = jax.random.PRNGKey(0)
    k_x, k_p = jax.random.split(key)

    B, N, input_dim = 2, 8, 32
    dim, output_dim = 32, 16
    up_sampling_ratio = 4

    x = jax.random.normal(k_x, (B, N, input_dim), jnp.float32)
    params = init_params(
        k_p, input_dim=input_dim, dim=dim, output_dim=output_dim,
        depth=2, heads=4, dim_head=8, ff_mult=2, conv_expansion=2,
        conv_kernel=7, up_sampling_ratio=up_sampling_ratio)

    out = decoder_forward(params, x, need_transpose=True)
    out = jax.block_until_ready(out)

    assert out.shape == (B, N * up_sampling_ratio, output_dim), out.shape
    assert bool(jnp.all(jnp.isfinite(out)))
    print("KERNEL_OK")
</pallas_src>

<mosaic_0001>
module attributes {stable_mosaic.version = 11 : i64} {
  func.func @_linear_kernel(%arg0: i32, %arg1: memref<16x32xf32, #tpu.memory_space<vmem>>, %arg2: memref<32x32xf32, #tpu.memory_space<vmem>>, %arg3: memref<1x32xf32, #tpu.memory_space<vmem>>, %arg4: memref<16x32xf32, #tpu.memory_space<vmem>>) attributes {dimension_semantics = [#tpu.dimension_semantics<parallel>], iteration_bounds = array<i64: 1>, scalar_prefetch = 0 : i64, scratch_operands = 0 : i64, tpu.core_type = #tpu.core_type<tc>, window_params = [{transform_indices = @transform_0, window_bounds = array<i64: 16, 32>}, {pipeline_mode = #tpu.pipeline_mode<synchronous>, transform_indices = @transform_1, window_bounds = array<i64: 32, 32>}, {pipeline_mode = #tpu.pipeline_mode<synchronous>, transform_indices = @transform_2, window_bounds = array<i64: 1, 32>}, {transform_indices = @transform_3, window_bounds = array<i64: 16, 32>}]} {
    %c0 = arith.constant 0 : index
    %c0_0 = arith.constant 0 : index
    %0 = vector.load %arg1[%c0, %c0_0] : memref<16x32xf32, #tpu.memory_space<vmem>>, vector<16x32xf32>
    %c0_1 = arith.constant 0 : index
    %c0_2 = arith.constant 0 : index
    %1 = vector.load %arg2[%c0_1, %c0_2] : memref<32x32xf32, #tpu.memory_space<vmem>>, vector<32x32xf32>
    %2 = arith.truncf %0 : vector<16x32xf32> to vector<16x32xbf16>
    %3 = arith.truncf %1 : vector<32x32xf32> to vector<32x32xbf16>
    %cst = arith.constant dense<0.000000e+00> : vector<16x32xf32>
    %4 = tpu.matmul %2, %3, %cst {dimension_numbers = #tpu.dot_dimension_numbers<[1], [0], [0], [1], [0, 0, 1, 1], [], []>} : vector<16x32xbf16>, vector<32x32xbf16>, vector<16x32xf32> -> vector<16x32xf32>
    %c0_3 = arith.constant 0 : index
    %c0_4 = arith.constant 0 : index
    %5 = vector.load %arg3[%c0_3, %c0_4] : memref<1x32xf32, #tpu.memory_space<vmem>>, vector<1x32xf32>
    %6 = vector.broadcast %5 : vector<1x32xf32> to vector<16x32xf32>
    %7 = arith.addf %4, %6 : vector<16x32xf32>
    %c0_5 = arith.constant 0 : index
    %c0_6 = arith.constant 0 : index
    %8 = vector.load %arg4[%c0_5, %c0_6] : memref<16x32xf32, #tpu.memory_space<vmem>>, vector<16x32xf32>
    tpu.vector_store %arg4[%c0_5, %c0_6], %7 {strides = array<i32>} : memref<16x32xf32, #tpu.memory_space<vmem>>, vector<16x32xf32>,
    return
  }
  func.func @transform_0(%arg0: i32) -> (i32, i32) {
    %c0_i32 = arith.constant 0 : i32
    %c0_i32_0 = arith.constant 0 : i32
    return %arg0, %c0_i32 : i32, i32
  }
  func.func @transform_1(%arg0: i32) -> (i32, i32) {
    %c0_i32 = arith.constant 0 : i32
    %c0_i32_0 = arith.constant 0 : i32
    %c0_i32_1 = arith.constant 0 : i32
    return %c0_i32, %c0_i32_0 : i32, i32
  }
  func.func @transform_2(%arg0: i32) -> (i32, i32) {
    %c0_i32 = arith.constant 0 : i32
    %c0_i32_0 = arith.constant 0 : i32
    %c0_i32_1 = arith.constant 0 : i32
    return %c0_i32, %c0_i32_0 : i32, i32
  }
  func.func @transform_3(%arg0: i32) -> (i32, i32) {
    %c0_i32 = arith.constant 0 : i32
    %c0_i32_0 = arith.constant 0 : i32
    return %arg0, %c0_i32 : i32, i32
  }
}

</mosaic_0001>

<bundles_post_ra>
// kernel: tpu_custom_call.1
= control target key start
LH: loop header
LB: loop body
LE: loop exit
PB: predicated region body
PF: predicated region fallthrough
CT: control target
= control target key end

     0   :  { %8 = vsyncpa [#allocation3], 0  ;;  %s292_s0 = inlined_call_operand.hbm [shape: f32[16,32], index: 0, kind: input, shape index: {}]   ;;  %s293_s1 = inlined_call_operand.hbm [shape: f32[32,32], index: 1, kind: input, shape index: {}]   ;;  %s294_s2 = inlined_call_operand.vmem [shape: f32[1,32], index: 2, kind: input, shape index: {}]   ;;  %s295_s3 = inlined_call_operand.hbm [shape: f32[16,32], index: 3, kind: output, shape index: {}]  }
   0x1   :  { %9 = vsyncpa [#allocation6], 0 }
   0x2   :  { %10 = vsyncpa [#allocation4], 0  ;;  %s217_s12 = smov [#allocation2]   ;;  %s145_s16 = scalar_lea.hbm %s292_s0, 256 }
   0x3   :  { %s16_s13 = sshll.u32 %s217_s12, 4  ;;  %p146_p0 = scmp.ne.s32.totalorder %s292_s0, %s145_s16  ;;  %s17_s13 = int_to_ptr.vmem [resolvable:$true] %s16_s13 }
   0x4   :  { %p149_p1 = scmp.lt.u32.totalorder %s145_s16, %s292_s0 }
   0x6   :  { %p151_p2 = pnand %p149_p1, %p146_p0 }
   0x8   :  { %154 = shalt.err (!%p151_p2)
}
   0x9   :  { %s155_s21 = scalar_lea.vmem %s17_s13, 256  ;;  %p160_p4 = scmp.lt.s32.totalorder %s17_s13, %s17_s13 }
   0xa   :  { %p156_p3 = scmp.ne.s32.totalorder %s17_s13, %s155_s21  ;;  %p161_p5 = scmp.lt.s32.totalorder %s155_s21, %s155_s21 }
   0xc   :  { %p162_p6 = por %p161_p5, %p160_p4 }
   0xe   :  { %p163_p7 = pnand %p162_p6, %p156_p3 }
  0x10   :  { %166 = shalt.err (!%p163_p7)
}
  0x11   :  { %s218_s22 = smov 128   ;;  %s219_s23 = smov 8  }
  0x12   :  { %22 = dma.hbm_to_vmem [thread:$0]  %s292_s0, 256, %s17_s13, [#allocation3], %s218_s22, %s218_s22, %s219_s23  }
  0x13   :  { %s220_s26 = smov [#allocation5]   ;;  %s167_s30 = scalar_lea.hbm %s293_s1, 512 }
  0x14   :  { %s28_s27 = sshll.u32 %s220_s26, 4  ;;  %p168_p8 = scmp.ne.s32.totalorder %s293_s1, %s167_s30  ;;  %s29_s27 = int_to_ptr.vmem [resolvable:$true] %s28_s27 }
  0x15   :  { %p171_p9 = scmp.lt.u32.totalorder %s167_s30, %s293_s1 }
  0x17   :  { %p173_p10 = pnand %p171_p9, %p168_p8 }
  0x19   :  { %176 = shalt.err (!%p173_p10)
}
  0x1a   :  { %s177_s8 = scalar_lea.vmem %s29_s27, 512  ;;  %p182_p12 = scmp.lt.s32.totalorder %s29_s27, %s29_s27 }
  0x1b   :  { %p178_p11 = scmp.ne.s32.totalorder %s29_s27, %s177_s8  ;;  %p183_p13 = scmp.lt.s32.totalorder %s177_s8, %s177_s8 }
  0x1d   :  { %p184_p0 = por %p183_p13, %p182_p12 }
  0x1f   :  { %p185_p1 = pnand %p184_p0, %p178_p11 }
  0x21   :  { %188 = shalt.err (!%p185_p1)
}
  0x22   :  { %34 = dma.hbm_to_vmem [thread:$0]  %s293_s1, 512, %s29_s27, [#allocation6], %s218_s22, %s218_s22, %s219_s23  }
  0x23   :  { %211 = dma.done.wait [#allocation3], 256  }
  0x24   :  { %212 = vsyncadd [#allocation3], 4294967040 }
  0x25   :  { %213 = dma.done.wait [#allocation6], 512  }
  0x26   :  { %214 = vsyncadd [#allocation6], 4294966784  ;;  %v221_v0 = vmov 0.0   ;;  %vm222_vm0 = vmmov 0   ;;  %v46_v1 = vld [vmem:[#allocation5] sm:$0xff]  ;;  %v47_v2 = vld [vmem:[#allocation5 + $0x8] sm:$0xff] }
  0x27   :  { %130 = vmatprep.subr.bf16.mxu0 %v221_v0  ;;  %134 = vmatprep.mubr.msk.bf16.mxu0 %vm222_vm0, %v221_v0  ;;  %v48_v3 = vld [vmem:[#allocation5 + $0x10] sm:$0xff]  ;;  %v51_v4 = vpack.c.bf16 %v47_v2, %v46_v1  ;;  %v49_v5 = vld [vmem:[#allocation5 + $0x18] sm:$0xff]  ;;  %vm60_vm1 = vcmask 261120   ;;  %s223_s11 = smov [#allocation7]  }
  0x28   :  { %v52_v6 = vpack.c.bf16 %v49_v5, %v48_v3  ;;  %v44_v7 = vld [vmem:[#allocation2] sm:$0xff]  ;;  %v45_v8 = vld [vmem:[#allocation2 + $0x8] sm:$0xff]  ;;  %s112_s12 = sshll.u32 %s223_s11, 4  ;;  %s113_s12 = int_to_ptr.vmem [resolvable:$true] %s112_s12 }
  0x29   :  { %131 = vmatpush3.bf16.msra.mxu0 %v51_v4  ;;  %v50_v9 = vpack.c.bf16 %v45_v8, %v44_v7  ;;  %v125_v10 = vld [vmem:[%s294_s2] ss:$0 sm:$0xff]  ;;  %s189_s13 = scalar_lea.vmem %s113_s12, 256  ;;  %p194_p3 = scmp.lt.s32.totalorder %s113_s12, %s113_s12 }
  0x2a   :  { %132 = vmatprep.subr.bf16.mxu0 %v221_v0  ;;  %p190_p2 = scmp.ne.s32.totalorder %s113_s12, %s189_s13  ;;  %p195_p4 = scmp.lt.s32.totalorder %s189_s13, %s189_s13 }
  0x2c   :  { %p196_p5 = por %p195_p4, %p194_p3 }
  0x2d   :  { %133 = vmatpush3.bf16.msra.mxu0 %v52_v6 }
  0x2e   :  { %p197_p6 = pnand %p196_p5, %p190_p2 }
  0x30   :  { %135 = vmatmul.mubr.msk.bf16.vlgmr.msra.gmra.mrb[0].mxu0 %vm60_vm1, %v50_v9 }
 0x103   :  { %v98_v11 = vpop.f32.mrb[0].mxu0 }
 0x104   :  { %v99_v12 = vadd.f32 %v125_v10, %v98_v11  ;;  %v136_v13 = vpop.f32.mrb[1].mxu0 }
 0x105   :  { %v101_v14 = vpop.f32.mrb[2].mxu0 }
 0x106   :  { %105 = vst.msk [vmem:[#allocation7] sm:$0xff] %vm60_vm1, %v99_v12  ;;  %v102_v15 = vadd.f32 %v125_v10, %v101_v14  ;;  %v137_v16 = vpop.f32.mrb[3].mxu0 }
 0x108   :  { %106 = vst.msk [vmem:[#allocation7 + $0x8] sm:$0xff] %vm60_vm1, %v102_v15 }
 0x109   :  { %200 = shalt.err (!%p197_p6)
}
 0x10a   :  { %s201_s15 = scalar_lea.hbm %s295_s3, 256 }
 0x10b   :  { %p202_p7 = scmp.ne.s32.totalorder %s295_s3, %s201_s15  ;;  %p205_p8 = scmp.lt.u32.totalorder %s201_s15, %s295_s3 }
 0x10d   :  { %p207_p9 = pnand %p205_p8, %p202_p7 }
 0x10f   :  { %210 = shalt.err (!%p207_p9)
}
 0x110   :  { %118 = dma.vmem_to_hbm [thread:$0]  %s113_s12, 256, %s295_s3, [#allocation4], %s218_s22, %s218_s22, %s219_s23  }
 0x111   :  { %215 = dma.done.wait [#allocation4], 256  }
 0x112   :  { %216 = vsyncadd [#allocation4], 4294967040 }
 0x113   :  { %122 = vsyncpa [#allocation3], 1 }
 0x114   :  { %123 = vsyncpa [#allocation6], 1 }
 0x115   :  { %124 = vsyncpa [#allocation4], 1 }

</bundles_post_ra>
